<compile_context>
chip_gen: v5e
topology: v5e:2x2
jax: 0.10.0
libtpu: 0.0.40
codegen_flags: <defaults>
</compile_context>

<pallas_src>
import jax
import jax.numpy as jnp
from jax.experimental import pallas as pl
from jax.experimental.pallas import tpu as pltpu

_LANE = 128
_SUBLANE = 8


def _round_up(x, m):
    return (x + m - 1) // m * m


def _vmem_budget_bytes():
    """Total bytes allowed for the pipelined (double-buffered) VMEM blocks.

    Stays well inside the default scoped-VMEM budget on every generation
    (16 MiB on v5e/v4, 32 MiB on v6e/v7x), so no vmem_limit_bytes override is
    needed; v6e/v7x get a larger budget (bigger tiles amortize the ~0.35 us
    per-grid-step overhead against their faster HBM).
    """
    try:
        kind = jax.devices()[0].device_kind.lower()
    except Exception:
        kind = ""
    if "v5" in kind:                                   # v5e / v5p: be conservative
        return 10 * 1024 * 1024
    if any(tag in kind for tag in ("v6", "v7", "7x")):  # 32 MiB default scoped VMEM
        return 24 * 1024 * 1024
    return 10 * 1024 * 1024                            # unknown chip: conservative


def _choose_tile_rows(num_rows, feature_dim, x_isz, t_isz, o_isz):
    """Rows per grid step, sized by the *padded* VMEM footprint.

    A (TM, D) block pads D up to 128 lanes; a (1, TM) block pads its single row
    up to 8 sublanes; each pipelined operand is double-buffered.
    """
    d_pad = _round_up(feature_dim, _LANE)
    per_row = (2 * d_pad * x_isz            # x tile, double buffered, lane-padded
               + 2 * _SUBLANE * t_isz       # targets (1, TM), sublane-padded
               + 2 * _SUBLANE * o_isz)      # output  (1, TM), sublane-padded
    tm = max(_LANE, _vmem_budget_bytes() // per_row // _LANE * _LANE)
    # Keep >= ~8 grid steps when the problem allows it, so input/output DMAs
    # overlap compute and the v7x megacore can split the "parallel" row axis.
    tm = min(tm, max(_LANE, (num_rows // (8 * _LANE)) * _LANE))
    if tm >= num_rows:
        # Tiny problem: a single block whose dims equal the array dims.
        return num_rows
    return tm


def _salience_kernel(bias_ref, x_ref, w_ref, t_ref, o_ref):
    """One grid step handles TM flattened (batch*seq) rows.

    bias_ref : SMEM (1, 1)  f32            -- linear bias
    x_ref    : VMEM (TM, D) native dtype   -- sentence embeddings (row tile)
    w_ref    : VMEM (D, 1)  f32            -- linear weight (resident, stationary)
    t_ref    : VMEM (1, TM) native dtype   -- salience targets (lane-major)
    o_ref    : VMEM (1, TM) out dtype      -- output (lane-major)
    """
    # x rows are pushed through the MXU against the tiny stationary (D, 1)
    # weight: no hidden (TM, D) -> (D, TM) transpose, no stationary-loading of
    # the big operand.  f32 accumulation.  (Default matmul precision matched
    # the f32 reference at 1e-5 on hardware; raise precision if D grows.)
    logits_col = jax.lax.dot_general(
        x_ref[...].astype(jnp.float32), w_ref[...],
        dimension_numbers=(((1,), (0,)), ((), ())),
        preferred_element_type=jnp.float32,
    )                                                   # (TM, 1) f32
    # Cheap relayout of TM scalars (1/D of the tile) to the lane-dense row
    # orientation so the store below is a full-width vst, not masked stores.
    logits_row = jnp.transpose(logits_col, (1, 0))       # (1, TM) f32
    scores = jnp.maximum(logits_row + bias_ref[0, 0], 0.0)
    o_ref[...] = (t_ref[...].astype(jnp.float32) * scores).astype(o_ref.dtype)


@jax.jit
def salience_forward(inputs, targets, weight, bias):
    """inputs: (B, S, D), targets: (B, S), weight: (1, D), bias: (1,) -> (B, S)."""
    B, S, D = inputs.shape
    R = B * S
    out_dtype = jnp.promote_types(inputs.dtype, targets.dtype)

    x = inputs.reshape(R, D)                  # contiguous view, no data movement
    t2 = targets.reshape(1, R)                # contiguous view, no data movement
    w = weight.reshape(D, 1).astype(jnp.float32)   # keep the Linear weight in f32
    b = bias.reshape(1, 1).astype(jnp.float32)

    TM = _choose_tile_rows(
        R, D,
        jnp.dtype(inputs.dtype).itemsize,
        jnp.dtype(targets.dtype).itemsize,
        jnp.dtype(out_dtype).itemsize,
    )
    num_tiles = pl.cdiv(R, TM)                # ragged tail -> partial edge blocks

    out = pl.pallas_call(
        _salience_kernel,
        out_shape=jax.ShapeDtypeStruct((1, R), out_dtype),
        grid=(num_tiles,),
        in_specs=[
            pl.BlockSpec(memory_space=pltpu.SMEM),           # bias scalar
            pl.BlockSpec((TM, D), lambda i: (i, 0)),         # x row tile (pushed LHS)
            pl.BlockSpec((D, 1), lambda i: (0, 0)),          # weight, resident
            pl.BlockSpec((1, TM), lambda i: (0, i)),         # targets, lane-dense
        ],
        out_specs=pl.BlockSpec((1, TM), lambda i: (0, i)),   # output, lane-dense
        compiler_params=pltpu.CompilerParams(
            dimension_semantics=("parallel",),               # megacore on v7x
        ),
    )(b, x, w, t2)
    return out.reshape(B, S)


def _reference(inputs, targets, weight, bias):
    # Pure-JAX reference matching the PyTorch module exactly.
    logits = jnp.einsum("bsd,od->bso", inputs.astype(jnp.float32),
                        weight.astype(jnp.float32)) + bias.astype(jnp.float32)
    return targets.astype(jnp.float32) * jax.nn.relu(logits[..., 0])


if __name__ == "__main__":
    # Small shapes consistent with the module: batch=2, seq=8, hidden=32.
    B, S, D = 2, 8, 32
    key = jax.random.PRNGKey(0)
    k_x, k_t, k_w, k_b = jax.random.split(key, 4)

    inputs = jax.random.normal(k_x, (B, S, D), dtype=jnp.float32)
    targets = jax.random.normal(k_t, (B, S), dtype=jnp.float32)

    # nn.Linear(D, 1) default init: U(-1/sqrt(D), 1/sqrt(D)) for weight & bias.
    bound = 1.0 / jnp.sqrt(jnp.float32(D))
    weight = jax.random.uniform(k_w, (1, D), jnp.float32, -bound, bound)
    bias = jax.random.uniform(k_b, (1,), jnp.float32, -bound, bound)

    out = jax.block_until_ready(salience_forward(inputs, targets, weight, bias))
    ref = _reference(inputs, targets, weight, bias)
    assert out.shape == (B, S)
    assert jnp.allclose(out.astype(jnp.float32), ref, atol=2e-5, rtol=2e-5), (out, ref)

    # Also exercise the multi-tile / ragged-edge (no-pad) path: R=150 rows ->
    # two 128-row tiles with a masked partial last block.
    B2, S2 = 3, 50
    k_x2, k_t2 = jax.random.split(jax.random.PRNGKey(1), 2)
    inputs2 = jax.random.normal(k_x2, (B2, S2, D), dtype=jnp.float32)
    targets2 = jax.random.normal(k_t2, (B2, S2), dtype=jnp.float32)
    out2 = jax.block_until_ready(salience_forward(inputs2, targets2, weight, bias))
    ref2 = _reference(inputs2, targets2, weight, bias)
    assert out2.shape == (B2, S2)
    assert jnp.allclose(out2.astype(jnp.float32), ref2, atol=2e-5, rtol=2e-5), (out2, ref2)

    print("KERNEL_OK")
</pallas_src>

<mosaic_0001>
module attributes {stable_mosaic.version = 11 : i64} {
  func.func @_salience_kernel(%arg0: i32, %arg1: memref<1x1xf32, #tpu.memory_space<smem>>, %arg2: memref<16x32xf32, #tpu.memory_space<vmem>>, %arg3: memref<32x1xf32, #tpu.memory_space<vmem>>, %arg4: memref<1x16xf32, #tpu.memory_space<vmem>>, %arg5: memref<1x16xf32, #tpu.memory_space<vmem>>) attributes {dimension_semantics = [#tpu.dimension_semantics<parallel>], iteration_bounds = array<i64: 1>, scalar_prefetch = 0 : i64, scratch_operands = 0 : i64, tpu.core_type = #tpu.core_type<tc>, window_params = [{transform_indices = @transform_0, window_bounds = array<i64: 1, 1>}, {transform_indices = @transform_1, window_bounds = array<i64: 16, 32>}, {pipeline_mode = #tpu.pipeline_mode<synchronous>, transform_indices = @transform_2, window_bounds = array<i64: 32, 1>}, {transform_indices = @transform_3, window_bounds = array<i64: 1, 16>}, {transform_indices = @transform_4, window_bounds = array<i64: 1, 16>}]} {
    %c0 = arith.constant 0 : index
    %c0_0 = arith.constant 0 : index
    %0 = vector.load %arg2[%c0, %c0_0] : memref<16x32xf32, #tpu.memory_space<vmem>>, vector<16x32xf32>
    %c0_1 = arith.constant 0 : index
    %c0_2 = arith.constant 0 : index
    %1 = vector.load %arg3[%c0_1, %c0_2] : memref<32x1xf32, #tpu.memory_space<vmem>>, vector<32x1xf32>
    %cst = arith.constant dense<0.000000e+00> : vector<16x1xf32>
    %2 = tpu.matmul %0, %1, %cst {dimension_numbers = #tpu.dot_dimension_numbers<[1], [0], [0], [1], [0, 0, 1, 1], [], []>} : vector<16x32xf32>, vector<32x1xf32>, vector<16x1xf32> -> vector<16x1xf32>
    %3 = tpu.transpose %2, [1, 0] : vector<16x1xf32> -> vector<1x16xf32>
    %c0_3 = arith.constant 0 : index
    %c0_4 = arith.constant 0 : index
    %4 = memref.load %arg1[%c0_3, %c0_4] : memref<1x1xf32, #tpu.memory_space<smem>>
    %5 = vector.broadcast %4 : f32 to vector<1x16xf32>
    %6 = arith.addf %3, %5 : vector<1x16xf32>
    %cst_5 = arith.constant 0.000000e+00 : f32
    %7 = vector.broadcast %cst_5 : f32 to vector<1x16xf32>
    %8 = arith.maximumf %6, %7 : vector<1x16xf32>
    %c0_6 = arith.constant 0 : index
    %c0_7 = arith.constant 0 : index
    %9 = vector.load %arg4[%c0_6, %c0_7] : memref<1x16xf32, #tpu.memory_space<vmem>>, vector<1x16xf32>
    %10 = arith.mulf %9, %8 : vector<1x16xf32>
    %c0_8 = arith.constant 0 : index
    %c0_9 = arith.constant 0 : index
    %11 = vector.load %arg5[%c0_8, %c0_9] : memref<1x16xf32, #tpu.memory_space<vmem>>, vector<1x16xf32>
    tpu.vector_store %arg5[%c0_8, %c0_9], %10 {strides = array<i32>} : memref<1x16xf32, #tpu.memory_space<vmem>>, vector<1x16xf32>,
    return
  }
  func.func @transform_0(%arg0: i32) -> (i32, i32) {
    %c0_i32 = arith.constant 0 : i32
    %c0_i32_0 = arith.constant 0 : i32
    %c0_i32_1 = arith.constant 0 : i32
    return %c0_i32, %c0_i32_0 : i32, i32
  }
  func.func @transform_1(%arg0: i32) -> (i32, i32) {
    %c0_i32 = arith.constant 0 : i32
    %c0_i32_0 = arith.constant 0 : i32
    return %arg0, %c0_i32 : i32, i32
  }
  func.func @transform_2(%arg0: i32) -> (i32, i32) {
    %c0_i32 = arith.constant 0 : i32
    %c0_i32_0 = arith.constant 0 : i32
    %c0_i32_1 = arith.constant 0 : i32
    return %c0_i32, %c0_i32_0 : i32, i32
  }
  func.func @transform_3(%arg0: i32) -> (i32, i32) {
    %c0_i32 = arith.constant 0 : i32
    %c0_i32_0 = arith.constant 0 : i32
    return %c0_i32, %arg0 : i32, i32
  }
  func.func @transform_4(%arg0: i32) -> (i32, i32) {
    %c0_i32 = arith.constant 0 : i32
    %c0_i32_0 = arith.constant 0 : i32
    return %c0_i32, %arg0 : i32, i32
  }
}

</mosaic_0001>

<bundles_post_ra>
// kernel: salience_forward.1
= control target key start
LH: loop header
LB: loop body
LE: loop exit
PB: predicated region body
PF: predicated region fallthrough
CT: control target
= control target key end

     0   :  { %vm24_vm0 = vcmask 261120   ;;  %vm92_vm1 = vcmask 122880   ;;  %s157_s2 = inlined_call_operand.vmem [shape: f32[32,1], index: 2, kind: input, shape index: {}]   ;;  %s158_s1 = inlined_call_operand.vmem [shape: f32[16,32], index: 1, kind: input, shape index: {}]   ;;  %s159_s0 = inlined_call_operand.<no memory space> [shape: f32[1,1], index: 0, kind: input, shape index: {}]   ;;  %s160_s3 = inlined_call_operand.vmem [shape: f32[1,16], index: 3, kind: input, shape index: {}]   ;;  %s161_s4 = inlined_call_operand.vmem [shape: f32[1,16], index: 4, kind: output, shape index: {}]  }
   0x1   :  { %v23_v0 = vld [vmem:[%s157_s2 + $0x18] sm:$0xff]  ;;  %v22_v1 = vld [vmem:[%s157_s2 + $0x10] sm:$0xff]  ;;  %v21_v2 = vld [vmem:[%s157_s2 + $0x8] sm:$0xff]  ;;  %v87_v8 = vstv %s159_s0 }
   0x2   :  { %43 = vmatpush.msra.mxu0 %v23_v0  ;;  %100 = vmatpush.msra.mxu1 %v23_v0  ;;  %v20_v3 = vld [vmem:[%s157_s2] sm:$0xff]  ;;  %v19_v5 = vld [vmem:[%s158_s1 + $0x8] sm:$0xff] }
   0x3   :  { %v18_v4 = vld [vmem:[%s158_s1] sm:$0xff] }
   0x4   :  { %44 = vmatpush.msra.mxu0 %v22_v1  ;;  %101 = vmatpush.msra.mxu1 %v22_v1  ;;  %v90_v11 = vld [vmem:[%s160_s3] sm:$0x1] }
   0x6   :  { %45 = vmatpush.msra.mxu0 %v21_v2  ;;  %102 = vmatpush.msra.mxu1 %v21_v2 }
   0x8   :  { %46 = vmatpush.msra.mxu0 %v20_v3  ;;  %103 = vmatpush.msra.mxu1 %v20_v3 }
   0x9   :  { %98 = vmatmul.msk.f32.vlgmr.msra.gmra.mxu0 %vm24_vm0, %v18_v4  ;;  %99 = vmatmul.msk.f32.vlgmr.msra.gmra.mxu1 %vm24_vm0, %v19_v5 }
  0x86   :  { %v48_v6 = vpop.f32.mrf.mxu0  ;;  %v51_v7 = vpop.f32.mrf.mxu1 }
  0x87   :  { %54 = vxpose.xlu0.b32.start [1/2] (short) (narrow) %v48_v6, 8 }
  0x8f   :  { %55 = vxpose.xlu0.b32.end [2/2] (short) (narrow) %v51_v7, 8 }
 0x12b   :  { %v70_v9 = vpop.trf.xlu0 }
 0x12c   :  { %v88_v10 = vadd.f32 %v87_v8, %v70_v9 }
 0x12e   :  { %v89_v12 = vmax.f32 %v88_v10, 0.0 }
 0x130   :  { %v91_v13 = vmul.f32 %v90_v11, %v89_v12 }
 0x132   :  { %93 = vst.msk [vmem:[%s161_s4] sm:$0x1] %vm92_vm1, %v91_v13 }

</bundles_post_ra>
